<compile_context>
chip_gen: v7x
topology: tpu7x:2x2x1
jax: 0.10.0
libtpu: 0.0.40
codegen_flags: <defaults>
</compile_context>

<pallas_src>
import functools

import jax
import jax.numpy as jnp
import numpy as np
from jax import lax
from jax.experimental import pallas as pl
from jax.experimental.pallas import tpu as pltpu

EPS = 1e-5  # PyTorch GroupNorm default


def _conv_block_kernel(x_ref, w_ref, b_ref, gamma_ref, beta_ref, mask_ref, o_ref,
                       *, depth, height, width, num_groups):
    # x_ref    : (Cin_pad, L_pad)      flattened halo-padded sample (bf16/f32)
    # w_ref    : (9, Cout, Cin_pad)    per-tap weights, tap t = ky*3 + kx
    # b_ref    : (Cout, 1)  f32        conv bias
    # gamma_ref: (Cout, 1)  f32        GroupNorm scale
    # beta_ref : (Cout, 1)  f32        GroupNorm shift
    # mask_ref : (1, M_pad) f32        1.0 on valid (non-halo, non-pad) lanes
    # o_ref    : (Cout, M_pad)         channel-major, lane-dense output
    cout, m_pad = o_ref.shape
    row = (height + 2) * width
    m_valid = float(depth * height * width)
    group_size = cout // num_groups
    inv_cnt = 1.0 / (m_valid * group_size)

    bias = b_ref[...]
    gamma = gamma_ref[...]
    beta = beta_ref[...]
    mask = mask_ref[...]

    # Tap offsets into the flattened lane dim, ordered (ky over D, kx over H)
    # to match w_ref's tap axis.
    offs = [ky * row + kx * width for ky in range(3) for kx in range(3)]

    # ---- Conv3d (3,3,1): 9 per-tap accumulating MXU dots (no im2col concat) ----
    acc = jnp.dot(w_ref[0], x_ref[:, offs[0]:offs[0] + m_pad],
                  preferred_element_type=jnp.float32)
    for t in range(1, 9):
        acc = acc + jnp.dot(w_ref[t], x_ref[:, offs[t]:offs[t] + m_pad],
                            preferred_element_type=jnp.float32)
    # acc: (Cout, M_pad) f32, conv output WITHOUT bias (bias folded below).

    # ---- GroupNorm stats: vectorized masked lane-reduces -----------------------
    am = acc * mask                                    # zero halo / pad lanes
    s_c = jnp.sum(am, axis=1, keepdims=True)           # (Cout, 1) sum of acc
    q_c = jnp.sum(am * acc, axis=1, keepdims=True)     # (Cout, 1) sum of acc^2

    # Fold the conv bias analytically into the per-channel sums (y = acc + bias):
    #   sum(y)   = s_c + m_valid * bias
    #   sum(y^2) = q_c + 2*bias*s_c + m_valid*bias^2
    s_y = s_c + bias * m_valid
    q_y = q_c + (2.0 * bias) * s_c + (bias * bias) * m_valid

    # Tiny group aggregate / broadcast via constant 0/1 matrices (O(Cout*G) work;
    # built from iotas + comparisons, no integer division, no gid input).
    g_row = lax.broadcasted_iota(jnp.int32, (num_groups, cout), 0)
    c_col = lax.broadcasted_iota(jnp.int32, (num_groups, cout), 1)
    lo = g_row * group_size
    agg = ((c_col >= lo) & (c_col < lo + group_size)).astype(jnp.float32)    # (G, Cout)

    c_row = lax.broadcasted_iota(jnp.int32, (cout, num_groups), 0)
    g_col = lax.broadcasted_iota(jnp.int32, (cout, num_groups), 1)
    lo2 = g_col * group_size
    bcast = ((c_row >= lo2) & (c_row < lo2 + group_size)).astype(jnp.float32)  # (Cout, G)

    sq = jnp.concatenate([s_y, q_y], axis=1)                                   # (Cout, 2)
    sq_g = jnp.dot(agg, sq, preferred_element_type=jnp.float32)                # (G, 2)
    mu_g = sq_g[:, 0:1] * inv_cnt
    var_g = sq_g[:, 1:2] * inv_cnt - mu_g * mu_g
    ri_g = lax.rsqrt(var_g + EPS)
    stats_c = jnp.dot(bcast, jnp.concatenate([mu_g, ri_g], axis=1),
                      preferred_element_type=jnp.float32)                      # (Cout, 2)
    mu_c = stats_c[:, 0:1]
    ri_c = stats_c[:, 1:2]

    # ---- Fused affine + ReLU: single multiply-add + max over (Cout, M_pad) -----
    a_c = ri_c * gamma
    b_c = (bias - mu_c) * a_c + beta
    o_ref[...] = jnp.maximum(acc * a_c + b_c, 0.0).astype(o_ref.dtype)


def _round_up(x, m):
    return -(-x // m) * m


def conv_block(x_ncdhw, w_pt, bias, gamma, beta, num_groups, *,
               compute_dtype=jnp.bfloat16):
    """x_ncdhw: (N, Cin, D, H, W); w_pt: (Cout, Cin, 3, 3, 1) (PyTorch layouts)."""
    N, Cin, D, H, W = x_ncdhw.shape
    Cout = w_pt.shape[0]
    assert Cout % num_groups == 0

    cin_pad = _round_up(Cin, 8)            # sublane-align channel dim
    row = (H + 2) * W
    m_ext = D * row                        # extended spatial (keeps H halo)
    m_pad = _round_up(m_ext, 128)          # lane-dense, unmasked stores
    L_pad = _round_up(2 * row + 2 * W + m_pad, 128)   # max tap offset + slab length

    # Flattened, halo-padded, channel-major input (input already NCDHW -> no transpose).
    xp = jnp.pad(x_ncdhw, ((0, 0), (0, cin_pad - Cin), (1, 1), (1, 1), (0, 0)))
    x_flat = xp.reshape(N, cin_pad, (D + 2) * row)
    x_flat = jnp.pad(x_flat, ((0, 0), (0, 0), (W, L_pad - (D + 2) * row - W)))

    # Per-tap weights: (9, Cout, Cin_pad), tap t = ky*3 + kx (matches offs order).
    wk = jnp.transpose(w_pt[:, :, :, :, 0], (2, 3, 0, 1)).reshape(9, Cout, Cin)
    wk = jnp.pad(wk, ((0, 0), (0, 0), (0, cin_pad - Cin)))

    if compute_dtype is not None:          # bf16 by default; f32 accumulation in-kernel
        x_flat = x_flat.astype(compute_dtype)
        wk = wk.astype(compute_dtype)

    b2 = bias.reshape(Cout, 1).astype(jnp.float32)
    g2 = gamma.reshape(Cout, 1).astype(jnp.float32)
    be2 = beta.reshape(Cout, 1).astype(jnp.float32)

    # Valid-lane mask over the padded extended spatial domain (drops H halo + lane pad).
    pos = np.arange(m_pad)
    hp = (pos // W) % (H + 2)
    valid = (pos < m_ext) & (hp >= 1) & (hp <= H)
    mask = jnp.asarray(valid.astype(np.float32)).reshape(1, m_pad)

    # VMEM budget derived from actual block sizes (double-buffered in/out blocks +
    # resident weights/params + f32 temporaries), capped by physical VMEM.
    in_bytes = jnp.dtype(x_flat.dtype).itemsize
    out_bytes = jnp.dtype(x_ncdhw.dtype).itemsize
    per_step = 2 * (cin_pad * L_pad * in_bytes + Cout * m_pad * out_bytes)
    resident = 2 * (9 * Cout * cin_pad * in_bytes + 3 * Cout * 4 + m_pad * 4)
    temps = 4 * Cout * m_pad * 4
    needed = int((per_step + resident + temps) * 1.25)
    try:
        vmem_cap = int(pltpu.get_tpu_info().vmem_capacity_bytes)
    except Exception:
        vmem_cap = 64 * 1024 * 1024        # conservative (v7x physical VMEM)
    vmem_limit = int(min(max(needed, 32 * 1024 * 1024), int(vmem_cap * 0.85)))

    kernel = functools.partial(_conv_block_kernel, depth=D, height=H, width=W,
                               num_groups=num_groups)

    out_ext = pl.pallas_call(
        kernel,
        out_shape=jax.ShapeDtypeStruct((N, Cout, m_pad), x_ncdhw.dtype),
        grid_spec=pltpu.PrefetchScalarGridSpec(
            num_scalar_prefetch=0,
            grid=(N,),                               # one sample per step, pipelined
            in_specs=[
                pl.BlockSpec((pl.Squeezed(), cin_pad, L_pad), lambda i: (i, 0, 0)),
                pl.BlockSpec((9, Cout, cin_pad), lambda i: (0, 0, 0)),
                pl.BlockSpec((Cout, 1), lambda i: (0, 0)),
                pl.BlockSpec((Cout, 1), lambda i: (0, 0)),
                pl.BlockSpec((Cout, 1), lambda i: (0, 0)),
                pl.BlockSpec((1, m_pad), lambda i: (0, 0)),
            ],
            out_specs=pl.BlockSpec((pl.Squeezed(), Cout, m_pad), lambda i: (i, 0, 0)),
        ),
        compiler_params=pltpu.CompilerParams(
            dimension_semantics=("parallel",),
            vmem_limit_bytes=vmem_limit),
    )(x_flat, wk, b2, g2, be2, mask)

    # Kernel emits channel-major output; drop lane padding + H halo. No transpose.
    out = out_ext[:, :, :m_ext].reshape(N, Cout, D, H + 2, W)[:, :, :, 1:H + 1, :]
    return out


def reference(x_ncdhw, w_pt, bias, gamma, beta, num_groups):
    """Pure-JAX reference mirroring the PyTorch module."""
    conv = lax.conv_general_dilated(
        x_ncdhw, w_pt, window_strides=(1, 1, 1),
        padding=((1, 1), (1, 1), (0, 0)),
        dimension_numbers=('NCDHW', 'OIDHW', 'NCDHW'),
        precision=lax.Precision.HIGHEST)
    conv = conv + bias.reshape(1, -1, 1, 1, 1)
    N, C, D, H, W = conv.shape
    g = conv.reshape(N, num_groups, C // num_groups, D, H, W)
    mean = g.mean(axis=(2, 3, 4, 5), keepdims=True)
    var = ((g - mean) ** 2).mean(axis=(2, 3, 4, 5), keepdims=True)
    gn = ((g - mean) / jnp.sqrt(var + EPS)).reshape(N, C, D, H, W)
    gn = gn * gamma.reshape(1, -1, 1, 1, 1) + beta.reshape(1, -1, 1, 1, 1)
    return jnp.maximum(gn, 0.0)


if __name__ == "__main__":
    # Small shapes consistent with the module: NCDHW input, Conv3d(4 -> 8, (3,3,1))
    N, Cin, Cout, D, H, W = 2, 4, 8, 8, 8, 4
    num_groups = Cout // 4

    key = jax.random.PRNGKey(0)
    kx, kw = jax.random.split(key)
    x = jax.random.normal(kx, (N, Cin, D, H, W), dtype=jnp.float32)

    # Deterministic "kaiming_normal_": std = sqrt(2 / fan_in), fan_in = Cin*3*3*1
    fan_in = Cin * 3 * 3 * 1
    w_pt = jax.random.normal(kw, (Cout, Cin, 3, 3, 1), dtype=jnp.float32) * np.sqrt(2.0 / fan_in)
    bias = jnp.zeros((Cout,), dtype=jnp.float32)       # conv.bias.data.zero_()
    gamma = jnp.ones((Cout,), dtype=jnp.float32)       # bn.weight.data.fill_(1)
    beta = jnp.zeros((Cout,), dtype=jnp.float32)       # bn.bias.data.zero_()

    out = conv_block(x, w_pt, bias, gamma, beta, num_groups)
    out = jax.block_until_ready(out)

    ref = jax.block_until_ready(reference(x, w_pt, bias, gamma, beta, num_groups))
    np.testing.assert_allclose(np.asarray(out), np.asarray(ref), atol=2e-2, rtol=2e-2)

    print("KERNEL_OK")
</pallas_src>

<mosaic_0001>
module attributes {stable_mosaic.version = 11 : i64} {
  func.func @_conv_block_kernel(%arg0: i32, %arg1: memref<1x8x512xbf16, #tpu.memory_space<vmem>>, %arg2: memref<9x8x8xbf16, #tpu.memory_space<vmem>>, %arg3: memref<8x1xf32, #tpu.memory_space<vmem>>, %arg4: memref<8x1xf32, #tpu.memory_space<vmem>>, %arg5: memref<8x1xf32, #tpu.memory_space<vmem>>, %arg6: memref<1x384xf32, #tpu.memory_space<vmem>>, %arg7: memref<1x8x384xf32, #tpu.memory_space<vmem>>) attributes {dimension_semantics = [#tpu.dimension_semantics<parallel>], iteration_bounds = array<i64: 2>, scalar_prefetch = 0 : i64, scratch_operands = 0 : i64, tpu.core_type = #tpu.core_type<tc>, window_params = [{transform_indices = @transform_0, window_bounds = array<i64: 1, 8, 512>}, {pipeline_mode = #tpu.pipeline_mode<synchronous>, transform_indices = @transform_1, window_bounds = array<i64: 9, 8, 8>}, {pipeline_mode = #tpu.pipeline_mode<synchronous>, transform_indices = @transform_2, window_bounds = array<i64: 8, 1>}, {pipeline_mode = #tpu.pipeline_mode<synchronous>, transform_indices = @transform_3, window_bounds = array<i64: 8, 1>}, {pipeline_mode = #tpu.pipeline_mode<synchronous>, transform_indices = @transform_4, window_bounds = array<i64: 8, 1>}, {pipeline_mode = #tpu.pipeline_mode<synchronous>, transform_indices = @transform_5, window_bounds = array<i64: 1, 384>}, {transform_indices = @transform_6, window_bounds = array<i64: 1, 8, 384>}]} {
    %c0 = arith.constant 0 : index
    %c0_0 = arith.constant 0 : index
    %0 = vector.load %arg3[%c0, %c0_0] : memref<8x1xf32, #tpu.memory_space<vmem>>, vector<8x1xf32>
    %c0_1 = arith.constant 0 : index
    %c0_2 = arith.constant 0 : index
    %1 = vector.load %arg4[%c0_1, %c0_2] : memref<8x1xf32, #tpu.memory_space<vmem>>, vector<8x1xf32>
    %c0_3 = arith.constant 0 : index
    %c0_4 = arith.constant 0 : index
    %2 = vector.load %arg5[%c0_3, %c0_4] : memref<8x1xf32, #tpu.memory_space<vmem>>, vector<8x1xf32>
    %c0_5 = arith.constant 0 : index
    %c0_6 = arith.constant 0 : index
    %3 = vector.load %arg6[%c0_5, %c0_6] : memref<1x384xf32, #tpu.memory_space<vmem>>, vector<1x384xf32>
    %c0_7 = arith.constant 0 : index
    %c0_8 = arith.constant 0 : index
    %c0_9 = arith.constant 0 : index
    %4 = vector.load %arg2[%c0_7, %c0_8, %c0_9] : memref<9x8x8xbf16, #tpu.memory_space<vmem>>, vector<1x8x8xbf16>
    %5 = vector.shape_cast %4 : vector<1x8x8xbf16> to vector<8x8xbf16>
    %c0_10 = arith.constant 0 : index
    %c0_11 = arith.constant 0 : index
    %c0_12 = arith.constant 0 : index
    %6 = vector.load %arg1[%c0_10, %c0_11, %c0_12] : memref<1x8x512xbf16, #tpu.memory_space<vmem>>, vector<1x8x384xbf16>
    %7 = vector.shape_cast %6 : vector<1x8x384xbf16> to vector<8x384xbf16>
    %cst = arith.constant dense<0.000000e+00> : vector<8x384xf32>
    %8 = tpu.matmul %5, %7, %cst {dimension_numbers = #tpu.dot_dimension_numbers<[1], [0], [0], [1], [0, 0, 1, 1], [], []>} : vector<8x8xbf16>, vector<8x384xbf16>, vector<8x384xf32> -> vector<8x384xf32>
    %c1 = arith.constant 1 : index
    %c0_13 = arith.constant 0 : index
    %c0_14 = arith.constant 0 : index
    %9 = vector.load %arg2[%c1, %c0_13, %c0_14] : memref<9x8x8xbf16, #tpu.memory_space<vmem>>, vector<1x8x8xbf16>
    %10 = vector.shape_cast %9 : vector<1x8x8xbf16> to vector<8x8xbf16>
    %c0_15 = arith.constant 0 : index
    %c0_16 = arith.constant 0 : index
    %c4 = arith.constant 4 : index
    %11 = vector.load %arg1[%c0_15, %c0_16, %c4] : memref<1x8x512xbf16, #tpu.memory_space<vmem>>, vector<1x8x384xbf16>
    %12 = vector.shape_cast %11 : vector<1x8x384xbf16> to vector<8x384xbf16>
    %cst_17 = arith.constant dense<0.000000e+00> : vector<8x384xf32>
    %13 = tpu.matmul %10, %12, %cst_17 {dimension_numbers = #tpu.dot_dimension_numbers<[1], [0], [0], [1], [0, 0, 1, 1], [], []>} : vector<8x8xbf16>, vector<8x384xbf16>, vector<8x384xf32> -> vector<8x384xf32>
    %14 = arith.addf %8, %13 : vector<8x384xf32>
    %c2 = arith.constant 2 : index
    %c0_18 = arith.constant 0 : index
    %c0_19 = arith.constant 0 : index
    %15 = vector.load %arg2[%c2, %c0_18, %c0_19] : memref<9x8x8xbf16, #tpu.memory_space<vmem>>, vector<1x8x8xbf16>
    %16 = vector.shape_cast %15 : vector<1x8x8xbf16> to vector<8x8xbf16>
    %c0_20 = arith.constant 0 : index
    %c0_21 = arith.constant 0 : index
    %c8 = arith.constant 8 : index
    %17 = vector.load %arg1[%c0_20, %c0_21, %c8] : memref<1x8x512xbf16, #tpu.memory_space<vmem>>, vector<1x8x384xbf16>
    %18 = vector.shape_cast %17 : vector<1x8x384xbf16> to vector<8x384xbf16>
    %cst_22 = arith.constant dense<0.000000e+00> : vector<8x384xf32>
    %19 = tpu.matmul %16, %18, %cst_22 {dimension_numbers = #tpu.dot_dimension_numbers<[1], [0], [0], [1], [0, 0, 1, 1], [], []>} : vector<8x8xbf16>, vector<8x384xbf16>, vector<8x384xf32> -> vector<8x384xf32>
    %20 = arith.addf %14, %19 : vector<8x384xf32>
    %c3 = arith.constant 3 : index
    %c0_23 = arith.constant 0 : index
    %c0_24 = arith.constant 0 : index
    %21 = vector.load %arg2[%c3, %c0_23, %c0_24] : memref<9x8x8xbf16, #tpu.memory_space<vmem>>, vector<1x8x8xbf16>
    %22 = vector.shape_cast %21 : vector<1x8x8xbf16> to vector<8x8xbf16>
    %c0_25 = arith.constant 0 : index
    %c0_26 = arith.constant 0 : index
    %c40 = arith.constant 40 : index
    %23 = vector.load %arg1[%c0_25, %c0_26, %c40] : memref<1x8x512xbf16, #tpu.memory_space<vmem>>, vector<1x8x384xbf16>
    %24 = vector.shape_cast %23 : vector<1x8x384xbf16> to vector<8x384xbf16>
    %cst_27 = arith.constant dense<0.000000e+00> : vector<8x384xf32>
    %25 = tpu.matmul %22, %24, %cst_27 {dimension_numbers = #tpu.dot_dimension_numbers<[1], [0], [0], [1], [0, 0, 1, 1], [], []>} : vector<8x8xbf16>, vector<8x384xbf16>, vector<8x384xf32> -> vector<8x384xf32>
    %26 = arith.addf %20, %25 : vector<8x384xf32>
    %c4_28 = arith.constant 4 : index
    %c0_29 = arith.constant 0 : index
    %c0_30 = arith.constant 0 : index
    %27 = vector.load %arg2[%c4_28, %c0_29, %c0_30] : memref<9x8x8xbf16, #tpu.memory_space<vmem>>, vector<1x8x8xbf16>
    %28 = vector.shape_cast %27 : vector<1x8x8xbf16> to vector<8x8xbf16>
    %c0_31 = arith.constant 0 : index
    %c0_32 = arith.constant 0 : index
    %c44 = arith.constant 44 : index
    %29 = vector.load %arg1[%c0_31, %c0_32, %c44] : memref<1x8x512xbf16, #tpu.memory_space<vmem>>, vector<1x8x384xbf16>
    %30 = vector.shape_cast %29 : vector<1x8x384xbf16> to vector<8x384xbf16>
    %cst_33 = arith.constant dense<0.000000e+00> : vector<8x384xf32>
    %31 = tpu.matmul %28, %30, %cst_33 {dimension_numbers = #tpu.dot_dimension_numbers<[1], [0], [0], [1], [0, 0, 1, 1], [], []>} : vector<8x8xbf16>, vector<8x384xbf16>, vector<8x384xf32> -> vector<8x384xf32>
    %32 = arith.addf %26, %31 : vector<8x384xf32>
    %c5 = arith.constant 5 : index
    %c0_34 = arith.constant 0 : index
    %c0_35 = arith.constant 0 : index
    %33 = vector.load %arg2[%c5, %c0_34, %c0_35] : memref<9x8x8xbf16, #tpu.memory_space<vmem>>, vector<1x8x8xbf16>
    %34 = vector.shape_cast %33 : vector<1x8x8xbf16> to vector<8x8xbf16>
    %c0_36 = arith.constant 0 : index
    %c0_37 = arith.constant 0 : index
    %c48 = arith.constant 48 : index
    %35 = vector.load %arg1[%c0_36, %c0_37, %c48] : memref<1x8x512xbf16, #tpu.memory_space<vmem>>, vector<1x8x384xbf16>
    %36 = vector.shape_cast %35 : vector<1x8x384xbf16> to vector<8x384xbf16>
    %cst_38 = arith.constant dense<0.000000e+00> : vector<8x384xf32>
    %37 = tpu.matmul %34, %36, %cst_38 {dimension_numbers = #tpu.dot_dimension_numbers<[1], [0], [0], [1], [0, 0, 1, 1], [], []>} : vector<8x8xbf16>, vector<8x384xbf16>, vector<8x384xf32> -> vector<8x384xf32>
    %38 = arith.addf %32, %37 : vector<8x384xf32>
    %c6 = arith.constant 6 : index
    %c0_39 = arith.constant 0 : index
    %c0_40 = arith.constant 0 : index
    %39 = vector.load %arg2[%c6, %c0_39, %c0_40] : memref<9x8x8xbf16, #tpu.memory_space<vmem>>, vector<1x8x8xbf16>
    %40 = vector.shape_cast %39 : vector<1x8x8xbf16> to vector<8x8xbf16>
    %c0_41 = arith.constant 0 : index
    %c0_42 = arith.constant 0 : index
    %c80 = arith.constant 80 : index
    %41 = vector.load %arg1[%c0_41, %c0_42, %c80] : memref<1x8x512xbf16, #tpu.memory_space<vmem>>, vector<1x8x384xbf16>
    %42 = vector.shape_cast %41 : vector<1x8x384xbf16> to vector<8x384xbf16>
    %cst_43 = arith.constant dense<0.000000e+00> : vector<8x384xf32>
    %43 = tpu.matmul %40, %42, %cst_43 {dimension_numbers = #tpu.dot_dimension_numbers<[1], [0], [0], [1], [0, 0, 1, 1], [], []>} : vector<8x8xbf16>, vector<8x384xbf16>, vector<8x384xf32> -> vector<8x384xf32>
    %44 = arith.addf %38, %43 : vector<8x384xf32>
    %c7 = arith.constant 7 : index
    %c0_44 = arith.constant 0 : index
    %c0_45 = arith.constant 0 : index
    %45 = vector.load %arg2[%c7, %c0_44, %c0_45] : memref<9x8x8xbf16, #tpu.memory_space<vmem>>, vector<1x8x8xbf16>
    %46 = vector.shape_cast %45 : vector<1x8x8xbf16> to vector<8x8xbf16>
    %c0_46 = arith.constant 0 : index
    %c0_47 = arith.constant 0 : index
    %c84 = arith.constant 84 : index
    %47 = vector.load %arg1[%c0_46, %c0_47, %c84] : memref<1x8x512xbf16, #tpu.memory_space<vmem>>, vector<1x8x384xbf16>
    %48 = vector.shape_cast %47 : vector<1x8x384xbf16> to vector<8x384xbf16>
    %cst_48 = arith.constant dense<0.000000e+00> : vector<8x384xf32>
    %49 = tpu.matmul %46, %48, %cst_48 {dimension_numbers = #tpu.dot_dimension_numbers<[1], [0], [0], [1], [0, 0, 1, 1], [], []>} : vector<8x8xbf16>, vector<8x384xbf16>, vector<8x384xf32> -> vector<8x384xf32>
    %50 = arith.addf %44, %49 : vector<8x384xf32>
    %c8_49 = arith.constant 8 : index
    %c0_50 = arith.constant 0 : index
    %c0_51 = arith.constant 0 : index
    %51 = vector.load %arg2[%c8_49, %c0_50, %c0_51] : memref<9x8x8xbf16, #tpu.memory_space<vmem>>, vector<1x8x8xbf16>
    %52 = vector.shape_cast %51 : vector<1x8x8xbf16> to vector<8x8xbf16>
    %c0_52 = arith.constant 0 : index
    %c0_53 = arith.constant 0 : index
    %c88 = arith.constant 88 : index
    %53 = vector.load %arg1[%c0_52, %c0_53, %c88] : memref<1x8x512xbf16, #tpu.memory_space<vmem>>, vector<1x8x384xbf16>
    %54 = vector.shape_cast %53 : vector<1x8x384xbf16> to vector<8x384xbf16>
    %cst_54 = arith.constant dense<0.000000e+00> : vector<8x384xf32>
    %55 = tpu.matmul %52, %54, %cst_54 {dimension_numbers = #tpu.dot_dimension_numbers<[1], [0], [0], [1], [0, 0, 1, 1], [], []>} : vector<8x8xbf16>, vector<8x384xbf16>, vector<8x384xf32> -> vector<8x384xf32>
    %56 = arith.addf %50, %55 : vector<8x384xf32>
    %57 = vector.broadcast %3 : vector<1x384xf32> to vector<8x384xf32>
    %58 = arith.mulf %56, %57 : vector<8x384xf32>
    %cst_55 = arith.constant dense<0.000000e+00> : vector<8xf32>
    %59 = vector.multi_reduction <add>, %58, %cst_55 [1] : vector<8x384xf32> to vector<8xf32>
    %60 = vector.shape_cast %59 : vector<8xf32> to vector<8x1xf32>
    %61 = arith.mulf %58, %56 : vector<8x384xf32>
    %cst_56 = arith.constant dense<0.000000e+00> : vector<8xf32>
    %62 = vector.multi_reduction <add>, %61, %cst_56 [1] : vector<8x384xf32> to vector<8xf32>
    %63 = vector.shape_cast %62 : vector<8xf32> to vector<8x1xf32>
    %cst_57 = arith.constant 2.560000e+02 : f32
    %64 = vector.broadcast %cst_57 : f32 to vector<8x1xf32>
    %65 = arith.mulf %0, %64 : vector<8x1xf32>
    %66 = arith.addf %60, %65 : vector<8x1xf32>
    %cst_58 = arith.constant 2.000000e+00 : f32
    %67 = vector.broadcast %cst_58 : f32 to vector<8x1xf32>
    %68 = arith.mulf %67, %0 : vector<8x1xf32>
    %69 = arith.mulf %68, %60 : vector<8x1xf32>
    %70 = arith.addf %63, %69 : vector<8x1xf32>
    %71 = arith.mulf %0, %0 : vector<8x1xf32>
    %cst_59 = arith.constant 2.560000e+02 : f32
    %72 = vector.broadcast %cst_59 : f32 to vector<8x1xf32>
    %73 = arith.mulf %71, %72 : vector<8x1xf32>
    %74 = arith.addf %70, %73 : vector<8x1xf32>
    %75 = tpu.iota {dimensions = array<i32: 0>} : vector<2x8xi32>
    %76 = tpu.iota {dimensions = array<i32: 1>} : vector<2x8xi32>
    %c4_i32 = arith.constant 4 : i32
    %77 = vector.broadcast %c4_i32 : i32 to vector<2x8xi32>
    %78 = arith.muli %75, %77 : vector<2x8xi32>
    %79 = arith.cmpi sge, %76, %78 : vector<2x8xi32>
    %c4_i32_60 = arith.constant 4 : i32
    %80 = vector.broadcast %c4_i32_60 : i32 to vector<2x8xi32>
    %81 = arith.addi %78, %80 : vector<2x8xi32>
    %82 = arith.cmpi slt, %76, %81 : vector<2x8xi32>
    %83 = arith.andi %79, %82 : vector<2x8xi1>
    %84 = arith.extui %83 : vector<2x8xi1> to vector<2x8xi32>
    %85 = arith.sitofp %84 : vector<2x8xi32> to vector<2x8xf32>
    %86 = tpu.iota {dimensions = array<i32: 0>} : vector<8x2xi32>
    %87 = tpu.iota {dimensions = array<i32: 1>} : vector<8x2xi32>
    %c4_i32_61 = arith.constant 4 : i32
    %88 = vector.broadcast %c4_i32_61 : i32 to vector<8x2xi32>
    %89 = arith.muli %87, %88 : vector<8x2xi32>
    %90 = arith.cmpi sge, %86, %89 : vector<8x2xi32>
    %c4_i32_62 = arith.constant 4 : i32
    %91 = vector.broadcast %c4_i32_62 : i32 to vector<8x2xi32>
    %92 = arith.addi %89, %91 : vector<8x2xi32>
    %93 = arith.cmpi slt, %86, %92 : vector<8x2xi32>
    %94 = arith.andi %90, %93 : vector<8x2xi1>
    %95 = arith.extui %94 : vector<8x2xi1> to vector<8x2xi32>
    %96 = arith.sitofp %95 : vector<8x2xi32> to vector<8x2xf32>
    %97 = tpu.concatenate %66, %74 in 1 : vector<8x1xf32>, vector<8x1xf32> -> vector<8x2xf32>
    %cst_63 = arith.constant dense<0.000000e+00> : vector<2x2xf32>
    %98 = tpu.matmul %85, %97, %cst_63 {dimension_numbers = #tpu.dot_dimension_numbers<[1], [0], [0], [1], [0, 0, 1, 1], [], []>} : vector<2x8xf32>, vector<8x2xf32>, vector<2x2xf32> -> vector<2x2xf32>
    %99 = vector.extract_strided_slice %98 {offsets = [0, 0], sizes = [2, 1], strides = [1, 1]} : vector<2x2xf32> to vector<2x1xf32>
    %cst_64 = arith.constant 9.765625E-4 : f32
    %100 = vector.broadcast %cst_64 : f32 to vector<2x1xf32>
    %101 = arith.mulf %99, %100 : vector<2x1xf32>
    %102 = vector.extract_strided_slice %98 {offsets = [0, 1], sizes = [2, 1], strides = [1, 1]} : vector<2x2xf32> to vector<2x1xf32>
    %cst_65 = arith.constant 9.765625E-4 : f32
    %103 = vector.broadcast %cst_65 : f32 to vector<2x1xf32>
    %104 = arith.mulf %102, %103 : vector<2x1xf32>
    %105 = arith.mulf %101, %101 : vector<2x1xf32>
    %106 = arith.subf %104, %105 : vector<2x1xf32>
    %cst_66 = arith.constant 9.99999974E-6 : f32
    %107 = vector.broadcast %cst_66 : f32 to vector<2x1xf32>
    %108 = arith.addf %106, %107 : vector<2x1xf32>
    %109 = math.rsqrt %108 : vector<2x1xf32>
    %110 = tpu.concatenate %101, %109 in 1 : vector<2x1xf32>, vector<2x1xf32> -> vector<2x2xf32>
    %cst_67 = arith.constant dense<0.000000e+00> : vector<8x2xf32>
    %111 = tpu.matmul %96, %110, %cst_67 {dimension_numbers = #tpu.dot_dimension_numbers<[1], [0], [0], [1], [0, 0, 1, 1], [], []>} : vector<8x2xf32>, vector<2x2xf32>, vector<8x2xf32> -> vector<8x2xf32>
    %112 = vector.extract_strided_slice %111 {offsets = [0, 0], sizes = [8, 1], strides = [1, 1]} : vector<8x2xf32> to vector<8x1xf32>
    %113 = vector.extract_strided_slice %111 {offsets = [0, 1], sizes = [8, 1], strides = [1, 1]} : vector<8x2xf32> to vector<8x1xf32>
    %114 = arith.mulf %113, %1 : vector<8x1xf32>
    %115 = arith.subf %0, %112 : vector<8x1xf32>
    %116 = arith.mulf %115, %114 : vector<8x1xf32>
    %117 = arith.addf %116, %2 : vector<8x1xf32>
    %118 = vector.broadcast %114 : vector<8x1xf32> to vector<8x384xf32>
    %119 = arith.mulf %56, %118 : vector<8x384xf32>
    %120 = vector.broadcast %117 : vector<8x1xf32> to vector<8x384xf32>
    %121 = arith.addf %119, %120 : vector<8x384xf32>
    %cst_68 = arith.constant 0.000000e+00 : f32
    %122 = vector.broadcast %cst_68 : f32 to vector<8x384xf32>
    %123 = arith.maximumf %121, %122 : vector<8x384xf32>
    %c0_69 = arith.constant 0 : index
    %c0_70 = arith.constant 0 : index
    %c0_71 = arith.constant 0 : index
    %124 = vector.load %arg7[%c0_69, %c0_70, %c0_71] : memref<1x8x384xf32, #tpu.memory_space<vmem>>, vector<1x8x384xf32>
    %125 = vector.shape_cast %124 : vector<1x8x384xf32> to vector<8x384xf32>
    %126 = vector.shape_cast %123 : vector<8x384xf32> to vector<1x8x384xf32>
    tpu.vector_store %arg7[%c0_69, %c0_70, %c0_71], %126 {strides = array<i32>} : memref<1x8x384xf32, #tpu.memory_space<vmem>>, vector<1x8x384xf32>,
    return
  }
  func.func @transform_0(%arg0: i32) -> (i32, i32, i32) {
    %c0_i32 = arith.constant 0 : i32
    %c0_i32_0 = arith.constant 0 : i32
    %c0_i32_1 = arith.constant 0 : i32
    return %arg0, %c0_i32, %c0_i32_0 : i32, i32, i32
  }
  func.func @transform_1(%arg0: i32) -> (i32, i32, i32) {
    %c0_i32 = arith.constant 0 : i32
    %c0_i32_0 = arith.constant 0 : i32
    %c0_i32_1 = arith.constant 0 : i32
    %c0_i32_2 = arith.constant 0 : i32
    return %c0_i32, %c0_i32_0, %c0_i32_1 : i32, i32, i32
  }
  func.func @transform_2(%arg0: i32) -> (i32, i32) {
    %c0_i32 = arith.constant 0 : i32
    %c0_i32_0 = arith.constant 0 : i32
    %c0_i32_1 = arith.constant 0 : i32
    return %c0_i32, %c0_i32_0 : i32, i32
  }
  func.func @transform_3(%arg0: i32) -> (i32, i32) {
    %c0_i32 = arith.constant 0 : i32
    %c0_i32_0 = arith.constant 0 : i32
    %c0_i32_1 = arith.constant 0 : i32
    return %c0_i32, %c0_i32_0 : i32, i32
  }
  func.func @transform_4(%arg0: i32) -> (i32, i32) {
    %c0_i32 = arith.constant 0 : i32
    %c0_i32_0 = arith.constant 0 : i32
    %c0_i32_1 = arith.constant 0 : i32
    return %c0_i32, %c0_i32_0 : i32, i32
  }
  func.func @transform_5(%arg0: i32) -> (i32, i32) {
    %c0_i32 = arith.constant 0 : i32
    %c0_i32_0 = arith.constant 0 : i32
    %c0_i32_1 = arith.constant 0 : i32
    return %c0_i32, %c0_i32_0 : i32, i32
  }
  func.func @transform_6(%arg0: i32) -> (i32, i32, i32) {
    %c0_i32 = arith.constant 0 : i32
    %c0_i32_0 = arith.constant 0 : i32
    %c0_i32_1 = arith.constant 0 : i32
    return %arg0, %c0_i32, %c0_i32_0 : i32, i32, i32
  }
}

</mosaic_0001>

<bundles_post_ra>
// kernel: tpu_custom_call.1
= control target key start
LH: loop header
LB: loop body
LE: loop exit
PB: predicated region body
PF: predicated region fallthrough
CT: control target
= control target key end

     0   :  { %11 = vsyncpa [#allocation3], 0  ;;  %s2245_s0 = inlined_call_operand.vmem [shape: bf16[2,8,512], index: 0, kind: input, shape index: {}]   ;;  %s2246_s1 = inlined_call_operand.vmem [shape: bf16[9,8,8], index: 1, kind: input, shape index: {}]   ;;  %s2247_s2 = inlined_call_operand.vmem [shape: f32[8,1], index: 2, kind: input, shape index: {}]   ;;  %s2248_s3 = inlined_call_operand.vmem [shape: f32[8,1], index: 3, kind: input, shape index: {}]   ;;  %s2249_s4 = inlined_call_operand.vmem [shape: f32[8,1], index: 4, kind: input, shape index: {}]   ;;  %s2250_s5 = inlined_call_operand.vmem [shape: f32[1,384], index: 5, kind: input, shape index: {}]   ;;  %s2251_s6 = inlined_call_operand.hbm [shape: f32[2,8,384], index: 6, kind: output, shape index: {}]  }
   0x1   :  { %13 = vsyncpa [#allocation3 + $0x1], 0  ;;  %s1966_s21 = smov 0   ;;  %s1968_s22 = smov 0  }
   0x2   :  { %s1970_s23 = smov 0   ;;  %s1972_s24 = smov 0  }
   0x3 LB: > { %s1987_s25 = sadd.s32 4294967295, %s1914_s24   ;;  %s1580_s26 = sadd.s32 4294967294, %s1914_s24   ;;  %s1914_s24 = sphi %s1972_s24, %s2257_s24   ;;  %s1910_s23 = sphi %s1970_s23, %s2256_s23   ;;  %s1906_s22 = sphi %s1968_s22, %s2255_s22   ;;  %s1902_s21 = sphi %s1966_s21, %s2254_s21  }
   0x4   : > { %s1991_s27 = sadd.s32 1, %s1914_s24   ;;  %s157_s28 = sadd.s32 1, %s1910_s23 }
   0x5   : > { %s154_s29 = ssub.s32 %s1914_s24, %s1991_s27  ;;  %p167_p0 = scmp.ne.s32.totalorder %s1910_s23, %s1906_s22 }
   0x6   : > { %p155_p1 = scmp.eq.s32.totalorder %s154_s29, 0  ;;  %p168_p2 = scmp.eq.s32.totalorder %s1987_s25, 1 }
   0x7   : > { %p173_p3 = scmp.ne.s32.totalorder %s1906_s22, %s1902_s21  ;;  %p174_p4 = scmp.eq.s32.totalorder %s1580_s26, 1 }
   0x8   : > { %s2002_s30 = scalar_select %p155_p1, %s1910_s23, %s157_s28  }
   0x9   : > { %p2004_p5 = por %p168_p2, %p167_p0  ;;  %p2008_p6 = por %p174_p4, %p173_p3 }
   0xa   : > { %p1583_p7 = scmp.ge.s32.totalorder %s1914_s24, 1  ;;  %p215_p8 = scmp.lt.s32.totalorder %s1914_s24, 3 }
   0xc   : > { %p216_p9 = pnand %p1583_p7, %p215_p8 }
   0xd   : > { %p245_p10 = scmp.lt.s32.totalorder (!%p216_p9), %s1987_s25, 1  ;;  %v1916_v0 = vmov (!%p216_p9), 0.0   ;;  %v1917_v1 = vmov (!%p216_p9), 0   ;;  %vm1918_vm0 = vmmov (!%p216_p9), 0   ;;  %s1919_s14 = smov (!%p216_p9), 124   ;;  %vm280_vm1 = vcmask (!%p216_p9), 1014784  }
   0xe   : > { %219 = sbr.rel (%p216_p9) target bundleno = 1560 (0x618), region = 44  ;;  %1659 = vmatprep.subr.bf16.mxu1 (!%p216_p9), %v1916_v0  ;;  %330 = vmatprep.mubr.bf16.mxu0 (!%p216_p9), %v1917_v1  ;;  %s1920_s15 = smov (!%p216_p9), 120   ;;  %vm288_vm2 = vcmask (!%p216_p9), 1043456   ;;  %v1586_v18 = vld [vmem:[%s2246_s1 + $0x4] sm:$0xf] (!%p216_p9)  ;;  %vm284_vm3 = vcmask (!%p216_p9), 64512  }
   0xf   : > { %1661 = vmatprep.mubr.msk.bf16.mxu1 (!%p216_p9), %vm1918_vm0, %v1916_v0  ;;  %1843 = vset.pattern.permute.xlu1 (!%p216_p9), %v1917_v1  ;;  %s1921_s16 = smov (!%p216_p9), 88   ;;  %s1922_s17 = smov (!%p216_p9), 84   ;;  %vm490_vm4 = vcmask (!%p216_p9), 982016   ;;  %v255_v29 = vld [vmem:[%s2246_s1] sm:$0xf] (!%p216_p9)  ;;  %vm600_vm5 = vcmask (!%p216_p9), 719872  }
  0x10   : > { %s1923_s18 = smov (!%p216_p9), 80   ;;  %s1924_s19 = smov (!%p216_p9), 48   ;;  %v1600_v39 = vld [vmem:[%s2246_s1 + $0x8] sm:$0xf] (!%p216_p9)  ;;  %vm710_vm6 = vcmask (!%p216_p9), 687104   ;;  %vm820_vm7 = vcmask (!%p216_p9), 654336  }
  0x11   : > { %s1925_s20 = smov (!%p216_p9), 44   ;;  %s1926_s26 = smov (!%p216_p9), 40   ;;  %v1604_v49 = vld [vmem:[%s2246_s1 + $0xc] sm:$0xf] (!%p216_p9)  ;;  %v1608_v59 = vld [vmem:[%s2246_s1 + $0x10] sm:$0xf] (!%p216_p9) }
  0x12   : > { %vm930_vm8 = vcmask (!%p216_p9), 392192   ;;  %vm1040_vm9 = vcmask (!%p216_p9), 359424   ;;  %vm1150_vm10 = vcmask (!%p216_p9), 326656   ;;  %vm1310_vm14 = vcmask (!%p216_p9), 7168   ;;  %s1788_s28 = smul.u32 (!%p216_p9), 384, %s1987_s25 }
  0x14   : > { %s2203_s12 = scalar_lea.hbm (!%p216_p9), %s2251_s6, %s1788_s28 }
  0x15   : > { %s246_s9 = scalar_select %p245_p10, %s1987_s25, 1 }
  0x17   : > { %s1636_s10 = sshll.u32 %s246_s9, 4 }
  0x18   : > { %s2024_s13 = scalar_lea.vmem %s2245_s0, %s1636_s10 }
  0x19   : > { %v261_v2 = vld [vmem:[%s2024_s13 + $0x8] sm:$0xff]  ;;  %v260_v3 = vld [vmem:[%s2024_s13] sm:$0xff] }
  0x1a   : > { %v1589_v4 = vcombine.low %v261_v2, %v261_v2  ;;  %v1587_v5 = vcombine.low %v260_v3, %v260_v3  ;;  %v1590_v6 = vcombine.high %v261_v2, %v261_v2  ;;  %v1588_v7 = vcombine.high %v260_v3, %v260_v3  ;;  %v1849_v12 = vld [vmem:[%s2024_s13 + $0x8] ss:$0 sps:$4 sm:$0xff]  }
  0x1b   : > { %v397_v21 = vsel %vm288_vm2, %v1849_v12, 0 }
  0x1c   : > { %276 = vrot.lane.b32.xlu1 %v1589_v4, %s1919_s14  ;;  %272 = vrot.lane.b32.xlu0 %v1587_v5, %s1919_s14  ;;  %v391_v19 = vsel %vm288_vm2, %v1587_v5, 0 }
  0x20   : > { %278 = vrot.lane.b32.xlu1 %v1590_v6, %s1919_s14  ;;  %274 = vrot.lane.b32.xlu0 %v1588_v7, %s1919_s14  ;;  %s1927_s14 = smov 1  }
  0x24   : > { %482 = vrot.lane.b32.xlu0 %v1587_v5, %s1920_s15  ;;  %484 = vrot.lane.b32.xlu1 %v1588_v7, %s1920_s15 }
  0x28   : > { %486 = vrot.lane.b32.xlu0 %v1589_v4, %s1920_s15  ;;  %488 = vrot.lane.b32.xlu1 %v1590_v6, %s1920_s15 }
  0x2c   : > { %592 = vrot.lane.b32.xlu0 %v1587_v5, %s1921_s16  ;;  %594 = vrot.lane.b32.xlu1 %v1588_v7, %s1921_s16 }
  0x30   : > { %596 = vrot.lane.b32.xlu0 %v1589_v4, %s1921_s16  ;;  %598 = vrot.lane.b32.xlu1 %v1590_v6, %s1921_s16 }
  0x34   : > { %702 = vrot.lane.b32.xlu0 %v1587_v5, %s1922_s17  ;;  %704 = vrot.lane.b32.xlu1 %v1588_v7, %s1922_s17 }
  0x38   : > { %706 = vrot.lane.b32.xlu0 %v1589_v4, %s1922_s17  ;;  %708 = vrot.lane.b32.xlu1 %v1590_v6, %s1922_s17  ;;  %s1929_s17 = smov 127  }
  0x3c   : > { %812 = vrot.lane.b32.xlu0 %v1587_v5, %s1923_s18  ;;  %814 = vrot.lane.b32.xlu1 %v1588_v7, %s1923_s18 }
  0x40   : > { %816 = vrot.lane.b32.xlu0 %v1589_v4, %s1923_s18  ;;  %818 = vrot.lane.b32.xlu1 %v1590_v6, %s1923_s18 }
  0x44   : > { %922 = vrot.lane.b32.xlu0 %v1587_v5, %s1924_s19  ;;  %924 = vrot.lane.b32.xlu1 %v1588_v7, %s1924_s19 }
  0x48   : > { %926 = vrot.lane.b32.xlu0 %v1589_v4, %s1924_s19  ;;  %928 = vrot.lane.b32.xlu1 %v1590_v6, %s1924_s19 }
  0x4c   : > { %1032 = vrot.lane.b32.xlu0 %v1587_v5, %s1925_s20  ;;  %1034 = vrot.lane.b32.xlu1 %v1588_v7, %s1925_s20 }
  0x50   : > { %1036 = vrot.lane.b32.xlu0 %v1589_v4, %s1925_s20  ;;  %1038 = vrot.lane.b32.xlu1 %v1590_v6, %s1925_s20  ;;  %s242_s20 = sand.u32 1, %s1906_s22  }
  0x51   : > { %s1507_s25 = scalar_lea.sflag [#allocation3], %s242_s20 }
  0x54   : > { %1142 = vrot.lane.b32.xlu0 %v1587_v5, %s1926_s26  ;;  %1144 = vrot.lane.b32.xlu1 %v1588_v7, %s1926_s26 }
  0x58   : > { %1146 = vrot.lane.b32.xlu0 %v1589_v4, %s1926_s26  ;;  %1148 = vrot.lane.b32.xlu1 %v1590_v6, %s1926_s26  ;;  %s1787_s26 = smul.u32 24, %s242_s20 }
  0x5a   : > { %s244_s29 = scalar_lea.vmem [#allocation2], %s1787_s26 }
  0x5b   : > { %s1521_s9 = sshll.u32 %s244_s29, 4  ;;  %s2205_s9 = int_to_ptr.vmem [resolvable:$true] %s1521_s9 }
  0x5c   : > { %s1852_s13 = scalar_lea.vmem %s2205_s9, 384 }
  0x5d   : > { %p1853_p11 = scmp.ne.s32.totalorder %s2205_s9, %s1852_s13 }
  0x5f   : > { %p1854_p12 = pnand %p1853_p11, %p2004_p5 }
  0x61   : > { %p1855_p13 = pneg %p1854_p12 }
  0x8e   : > { %v277_v8 = vpop.permute.xlu1 %276  ;;  %v273_v9 = vpop.permute.xlu0 %272 }
  0x92   : > { %v279_v10 = vpop.permute.xlu1 %278  ;;  %v275_v11 = vpop.permute.xlu0 %274 }
  0x93   : > { %v282_v13 = vsel %vm280_vm1, %v275_v11, %v277_v8  ;;  %v281_v14 = vsel %vm280_vm1, %v273_v9, %v275_v11  ;;  %v283_v15 = vsel %vm280_vm1, %v277_v8, %v279_v10 }
  0x94   : > { %1591 = vmatprep.subr.msk.bf16.mxu0 %vm288_vm2, %v282_v13  ;;  %v290_v16 = vsel %vm288_vm2, %v281_v14, 0  ;;  %v296_v17 = vsel %vm288_vm2, %v283_v15, 0 }
  0x95   : > { %299 = vmatpush1.bf16.msra.mxu0 %v290_v16  ;;  %1660 = vmatpush3.bf16.msra.mxu1 %v296_v17  ;;  %v1616_v17 = vld [vmem:[%s2246_s1 + $0x18] sm:$0xf] }
  0x96   : > { %1597 = vmatprep.subr.msk.bf16.mxu0 %vm288_vm2, %v1588_v7  ;;  %1665 = vmatprep.subr.bf16.mxu1 %v1916_v0  ;;  %v483_v20 = vpop.permute.xlu0 %482  ;;  %v485_v22 = vpop.permute.xlu1 %484  ;;  %v1612_v7 = vld [vmem:[%s2246_s1 + $0x14] sm:$0xf] }
  0x97   : > { %v491_v27 = vsel %vm490_vm4, %v483_v20, %v485_v22 }
  0x98   : > { %1592 = vmatmul.mubr.msk.bf16.vlgmr.msra.gmra.mrb[0].mxu0 %vm284_vm3, %v1586_v18  ;;  %1662 = vmatmul.mubr.msk.bf16.vlgmr.msra.gmra.mrb[0].mxu1 %vm284_vm3, %v1586_v18  ;;  %v498_v31 = vsel %vm288_vm2, %v491_v27, 0 }
  0x99   : > { %400 = vmatpush1.bf16.msra.mxu0 %v391_v19  ;;  %1666 = vmatpush3.bf16.msra.mxu1 %v397_v21 }
  0x9a   : > { %431 = vmatprep.mubr.bf16.mxu0 %v1917_v1  ;;  %1667 = vmatprep.mubr.msk.bf16.mxu1 %vm1918_vm0, %v1916_v0  ;;  %v487_v23 = vpop.permute.xlu0 %486  ;;  %v489_v25 = vpop.permute.xlu1 %488 }
  0x9b   : > { %v492_v24 = vsel %vm490_vm4, %v485_v22, %v487_v23  ;;  %1671 = vmatprep.subr.bf16.mxu1 %v1916_v0  ;;  %v493_v28 = vsel %vm490_vm4, %v487_v23, %v489_v25 }
  0x9c   : > { %1601 = vmatprep.subr.msk.bf16.mxu0 %vm288_vm2, %v492_v24  ;;  %v504_v32 = vsel %vm288_vm2, %v493_v28, 0 }
  0x9e   : > { %v593_v26 = vpop.permute.xlu0 %592  ;;  %v595_v30 = vpop.permute.xlu1 %594 }
  0x9f   : > { %v601_v37 = vsel %vm600_vm5, %v593_v26, %v595_v30  ;;  %v1620_v26 = vld [vmem:[%s2246_s1 + $0x1c] sm:$0xf] }
  0xa0   : > { %v608_v42 = vsel %vm288_vm2, %v601_v37, 0 }
  0xa2   : > { %v597_v33 = vpop.permute.xlu0 %596  ;;  %v599_v36 = vpop.permute.xlu1 %598 }
  0xa3   : > { %v602_v34 = vsel %vm600_vm5, %v595_v30, %v597_v33  ;;  %v603_v38 = vsel %vm600_vm5, %v597_v33, %v599_v36  ;;  %v1251_v30 = vlaneseq  ;;  %v254_v33 = vld [vmem:[%s2250_s5] sm:$0x7] }
  0xa4   : > { %1598 = vmatmul.mubr.msk.bf16.vlgmr.msra.gmra.mrb[0].mxu0 %vm284_vm3, %v255_v29  ;;  %1668 = vmatmul.mubr.msk.bf16.vlgmr.msra.gmra.mrb[0].mxu1 %vm284_vm3, %v255_v29  ;;  %v614_v43 = vsel %vm288_vm2, %v603_v38, 0  ;;  %v1624_v29 = vld [vmem:[%s2246_s1 + $0x20] sm:$0xf] }
  0xa5   : > { %507 = vmatpush1.bf16.msra.mxu0 %v498_v31  ;;  %1672 = vmatpush3.bf16.msra.mxu1 %v504_v32  ;;  %v2157_v31 = vshrl.u32 %v1251_v30, 7 }
  0xa6   : > { %538 = vmatprep.mubr.bf16.mxu0 %v1917_v1  ;;  %1673 = vmatprep.mubr.msk.bf16.mxu1 %vm1918_vm0, %v1916_v0  ;;  %v703_v35 = vpop.permute.xlu0 %702  ;;  %v705_v40 = vpop.permute.xlu1 %704 }
  0xa7   : > { %1605 = vmatprep.subr.msk.bf16.mxu0 %vm288_vm2, %v602_v34  ;;  %1677 = vmatprep.subr.bf16.mxu1 %v1916_v0  ;;  %v711_v47 = vsel %vm710_vm6, %v703_v35, %v705_v40  ;;  %v1253_v32 = vsub.s32 0, %v2157_v31  ;;  %v1257_v34 = vsub.s32 1, %v2157_v31  ;;  %v1261_v35 = vsub.s32 2, %v2157_v31 }
  0xa8   : > { %v718_v52 = vsel %vm288_vm2, %v711_v47, 0 }
  0xa9   : > { %v1254_v36 = vrot.slane %v254_v33, %v1253_v32  ;;  %v1258_v37 = vrot.slane %v254_v33, %v1257_v34  ;;  %v1262_v38 = vrot.slane %v254_v33, %v1261_v35 }
  0xaa   : > { %v707_v41 = vpop.permute.xlu0 %706  ;;  %v709_v46 = vpop.permute.xlu1 %708 }
  0xab   : > { %v712_v44 = vsel %vm710_vm6, %v705_v40, %v707_v41  ;;  %v713_v48 = vsel %vm710_vm6, %v707_v41, %v709_v46 }
  0xac   : > { %v724_v53 = vsel %vm288_vm2, %v713_v48, 0 }
  0xae   : > { %v813_v45 = vpop.permute.xlu0 %812  ;;  %v815_v50 = vpop.permute.xlu1 %814 }
  0xaf   : > { %v821_v57 = vsel %vm820_vm7, %v813_v45, %v815_v50 }
  0xb0   : > { %1602 = vmatmul.mubr.msk.bf16.vlgmr.msra.gmra.mrb[0].mxu0 %vm284_vm3, %v1600_v39  ;;  %1674 = vmatmul.mubr.msk.bf16.vlgmr.msra.gmra.mrb[0].mxu1 %vm284_vm3, %v1600_v39  ;;  %v828_v62 = vsel %vm288_vm2, %v821_v57, 0  ;;  %v251_v57 = vld [vmem:[%s2247_s2] sm:$0xff] }
  0xb1   : > { %617 = vmatpush1.bf16.msra.mxu0 %v608_v42  ;;  %1678 = vmatpush3.bf16.msra.mxu1 %v614_v43 }
  0xb2   : > { %648 = vmatprep.mubr.bf16.mxu0 %v1917_v1  ;;  %1679 = vmatprep.mubr.msk.bf16.mxu1 %vm1918_vm0, %v1916_v0  ;;  %v817_v51 = vpop.permute.xlu0 %816  ;;  %v819_v56 = vpop.permute.xlu1 %818 }
  0xb3   : > { %1609 = vmatprep.subr.msk.bf16.mxu0 %vm288_vm2, %v712_v44  ;;  %1683 = vmatprep.subr.bf16.mxu1 %v1916_v0  ;;  %v822_v54 = vsel %vm820_vm7, %v815_v50, %v817_v51  ;;  %v823_v58 = vsel %vm820_vm7, %v817_v51, %v819_v56 }
  0xb4   : > { %v834_v63 = vsel %vm288_vm2, %v823_v58, 0  ;;  %v1282_v58 = vmul.f32 2.0, %v251_v57 }
  0xb6   : > { %v923_v55 = vpop.permute.xlu0 %922  ;;  %v925_v60 = vpop.permute.xlu1 %924 }
  0xb7   : > { %v931_v5 = vsel %vm930_vm8, %v923_v55, %v925_v60 }
  0xb8   : > { %v938_v10 = vsel %vm288_vm2, %v931_v5, 0  ;;  %v1291_v5 = vand.u32 127, %v1251_v30 }
  0xba   : > { %v927_v61 = vpop.permute.xlu0 %926  ;;  %v929_v4 = vpop.permute.xlu1 %928 }
  0xbb   : > { %v932_v2 = vsel %vm930_vm8, %v925_v60, %v927_v61  ;;  %v933_v6 = vsel %vm930_vm8, %v927_v61, %v929_v4  ;;  %v1292_v4 = vmul.u32 4, %v2157_v31 }
  0xbc   : > { %1606 = vmatmul.mubr.msk.bf16.vlgmr.msra.gmra.mrb[0].mxu0 %vm284_vm3, %v1604_v49  ;;  %1680 = vmatmul.mubr.msk.bf16.vlgmr.msra.gmra.mrb[0].mxu1 %vm284_vm3, %v1604_v49  ;;  %v944_v11 = vsel %vm288_vm2, %v933_v6, 0 }
  0xbd   : > { %727 = vmatpush1.bf16.msra.mxu0 %v718_v52  ;;  %1684 = vmatpush3.bf16.msra.mxu1 %v724_v53  ;;  %v1294_v6 = vadd.s32 4, %v1292_v4  ;;  %vm1293_vm11 = vcmp.ge.s32.totalorder %v1291_v5, %v1292_v4 }
  0xbe   : > { %758 = vmatprep.mubr.bf16.mxu0 %v1917_v1  ;;  %1685 = vmatprep.mubr.msk.bf16.mxu1 %vm1918_vm0, %v1916_v0  ;;  %v1033_v3 = vpop.permute.xlu0 %1032  ;;  %v1035_v8 = vpop.permute.xlu1 %1034 }
  0xbf   : > { %1613 = vmatprep.subr.msk.bf16.mxu0 %vm288_vm2, %v822_v54  ;;  %1689 = vmatprep.subr.bf16.mxu1 %v1916_v0  ;;  %v1041_v15 = vsel %vm1040_vm9, %v1033_v3, %v1035_v8  ;;  %vm1295_vm12 = vcmp.lt.s32.totalorder %v1291_v5, %v1294_v6 }
  0xc0   : > { %v1048_v20 = vsel %vm288_vm2, %v1041_v15, 0  ;;  %vm1296_vm13 = vmand %vm1293_vm11, %vm1295_vm12 }
  0xc2   : > { %v1037_v9 = vpop.permute.xlu0 %1036  ;;  %v1039_v14 = vpop.permute.xlu1 %1038 }
  0xc3   : > { %v1042_v12 = vsel %vm1040_vm9, %v1035_v8, %v1037_v9  ;;  %v1043_v16 = vsel %vm1040_vm9, %v1037_v9, %v1039_v14 }
  0xc4   : > { %v1054_v21 = vsel %vm288_vm2, %v1043_v16, 0  ;;  %v252_v16 = vld [vmem:[%s2248_s3] sm:$0xff] }
  0xc6   : > { %v1143_v13 = vpop.permute.xlu0 %1142  ;;  %v1145_v18 = vpop.permute.xlu1 %1144 }
  0xc7   : > { %v1151_v24 = vsel %vm1150_vm10, %v1143_v13, %v1145_v18 }
  0xc8   : > { %1610 = vmatmul.mubr.msk.bf16.vlgmr.msra.gmra.mrb[0].mxu0 %vm284_vm3, %v1608_v59  ;;  %1686 = vmatmul.mubr.msk.bf16.vlgmr.msra.gmra.mrb[0].mxu1 %vm284_vm3, %v1608_v59  ;;  %v1158_v27 = vsel %vm288_vm2, %v1151_v24, 0  ;;  %v1285_v59 = vmul.f32 %v251_v57, %v251_v57 }
  0xc9   : > { %837 = vmatpush1.bf16.msra.mxu0 %v828_v62  ;;  %1690 = vmatpush3.bf16.msra.mxu1 %v834_v63 }
  0xca   : > { %868 = vmatprep.mubr.bf16.mxu0 %v1917_v1  ;;  %1691 = vmatprep.mubr.msk.bf16.mxu1 %vm1918_vm0, %v1916_v0  ;;  %v1147_v19 = vpop.permute.xlu0 %1146  ;;  %v1149_v23 = vpop.permute.xlu1 %1148  ;;  %v1286_v62 = vmul.f32 256.0, %v1285_v59 }
  0xcb   : > { %1617 = vmatprep.subr.msk.bf16.mxu0 %vm288_vm2, %v932_v2  ;;  %1695 = vmatprep.subr.bf16.mxu1 %v1916_v0  ;;  %v1152_v22 = vsel %vm1150_vm10, %v1145_v18, %v1147_v19  ;;  %v1153_v25 = vsel %vm1150_vm10, %v1147_v19, %v1149_v23  ;;  %v1299_v19 = vmul.u32 4, %v1291_v5 }
  0xcc   : > { %v1164_v28 = vsel %vm288_vm2, %v1153_v25, 0  ;;  %v1928_v25 = vmov 1  }
  0xcd   : > { %vm1300_vm15 = vcmp.ge.s32.totalorder %v2157_v31, %v1299_v19  ;;  %1842 = vset.pattern.permute.xlu0 %v1928_v25 }
  0xd4   : > { %1614 = vmatmul.mubr.msk.bf16.vlgmr.msra.gmra.mrb[0].mxu0 %vm284_vm3, %v1612_v7  ;;  %1692 = vmatmul.mubr.msk.bf16.vlgmr.msra.gmra.mrb[0].mxu1 %vm284_vm3, %v1612_v7  ;;  %v1280_v7 = vmul.f32 256.0, %v251_v57 }
  0xd5   : > { %947 = vmatpush1.bf16.msra.mxu0 %v938_v10  ;;  %1696 = vmatpush3.bf16.msra.mxu1 %v944_v11  ;;  %v1628_v10 = vsel %vm1296_vm13, 1.0, %v1916_v0 }
  0xd6   : > { %978 = vmatprep.mubr.bf16.mxu0 %v1917_v1  ;;  %1697 = vmatprep.mubr.msk.bf16.mxu1 %vm1918_vm0, %v1916_v0 }
  0xd7   : > { %1621 = vmatprep.subr.msk.bf16.mxu0 %vm288_vm2, %v1042_v12  ;;  %1701 = vmatprep.subr.bf16.mxu1 %v1916_v0 }
  0xe0   : > { %1618 = vmatmul.mubr.msk.bf16.vlgmr.msra.gmra.mrb[0].mxu0 %vm284_vm3, %v1616_v17  ;;  %1698 = vmatmul.mubr.msk.bf16.vlgmr.msra.gmra.mrb[0].mxu1 %vm284_vm3, %v1616_v17 }
  0xe1   : > { %1057 = vmatpush1.bf16.msra.mxu0 %v1048_v20  ;;  %1702 = vmatpush3.bf16.msra.mxu1 %v1054_v21  ;;  %v1301_v21 = vadd.s32 4, %v1299_v19 }
  0xe2   : > { %1088 = vmatprep.mubr.bf16.mxu0 %v1917_v1  ;;  %1703 = vmatprep.mubr.msk.bf16.mxu1 %vm1918_vm0, %v1916_v0 }
  0xe3   : > { %1625 = vmatprep.subr.msk.bf16.mxu0 %vm288_vm2, %v1152_v22  ;;  %1707 = vmatprep.subr.bf16.mxu1 %v1916_v0  ;;  %vm1399_vm2 = vcmask 1041408  }
  0xec   : > { %1622 = vmatmul.mubr.msk.bf16.vlgmr.msra.gmra.mrb[0].mxu0 %vm284_vm3, %v1620_v26  ;;  %1704 = vmatmul.mubr.msk.bf16.vlgmr.msra.gmra.mrb[0].mxu1 %vm284_vm3, %v1620_v26 }
  0xed   : > { %1167 = vmatpush1.bf16.msra.mxu0 %v1158_v27  ;;  %1708 = vmatpush3.bf16.msra.mxu1 %v1164_v28 }
  0xee   : > { %1198 = vmatprep.mubr.bf16.mxu0 %v1917_v1  ;;  %1709 = vmatprep.mubr.msk.bf16.mxu1 %vm1918_vm0, %v1916_v0 }
  0xef   : > { %1713 = vmatprep.subr.mxu0 %v1916_v0  ;;  %1718 = vmatprep.subr.mxu1 %v1916_v0 }
  0xf8   : > { %1626 = vmatmul.mubr.msk.bf16.vlgmr.msra.gmra.mrb[0].mxu0 %vm284_vm3, %v1624_v29  ;;  %1710 = vmatmul.mubr.msk.bf16.vlgmr.msra.gmra.mrb[0].mxu1 %vm284_vm3, %v1624_v29 }
  0xf9   : > { %1715 = vmatprep.mubr.msk.f32.mxu0 %vm1918_vm0, %v1916_v0  ;;  %1720 = vmatprep.mubr.msk.f32.mxu1 %vm1918_vm0, %v1916_v0  ;;  %vm1302_vm0 = vcmp.lt.s32.totalorder %v2157_v31, %v1301_v21 }
  0xfa   : > { %vm1303_vm1 = vmand %vm1300_vm15, %vm1302_vm0 }
  0xfb   : > { %v1629_v23 = vsel %vm1303_vm1, 1.0, %v1916_v0  ;;  %v253_v0 = vld [vmem:[%s2249_s4] sm:$0xff] }
 0x1cb   : > { %v2165_v39 = vpop.f32.mrb[0].mxu0  ;;  %v2167_v40 = vpop.f32.mrb[0].mxu1 }
 0x1cc   : > { %v1266_v41 = vmul.f32 %v1254_v36, %v2165_v39  ;;  %v2170_v42 = vpop.f32.mrb[1].mxu0  ;;  %v1711_v43 = vpop.f32.mrb[1].mxu1  ;;  %v1268_v47 = vmul.f32 %v1262_v38, %v2167_v40 }
 0x1cd   : > { %v1267_v44 = vmul.f32 %v1258_v37, %v2170_v42  ;;  %v1204_v45 = vpop.f32.mrb[2].mxu0  ;;  %v1244_v46 = vpop.f32.mrb[2].mxu1 }
 0x1ce   : > { %v1273_v48 = vmul.f32 %v1266_v41, %v2165_v39  ;;  %v1205_v49 = vpop.f32.mrb[3].mxu0  ;;  %v1712_v50 = vpop.f32.mrb[3].mxu1  ;;  %v1275_v54 = vmul.f32 %v1268_v47, %v2167_v40 }
 0x1cf   : > { %v1274_v51 = vmul.f32 %v1267_v44, %v2170_v42  ;;  %v1269_v52 = vadd.f32 %v1267_v44, %v1266_v41 }
 0x1d1   : > { %v1270_v53 = vadd.f32 %v1269_v52, %v1268_v47  ;;  %v1276_v55 = vadd.f32 %v1274_v51, %v1273_v48 }
 0x1d3   : > { %1271 = vadd.xlane.f32.xlu0 %v1270_v53  ;;  %v1277_v56 = vadd.f32 %v1276_v55, %v1275_v54 }
 0x1d5   : > { %1278 = vadd.xlane.f32.xlu1 %v1277_v56 }
 0x260   : > { %v1272_v60 = vpop.xlane.xlu0 %1271 }
 0x261   : > { %v1283_v61 = vmul.f32 %v1282_v58, %v1272_v60  ;;  %v1281_v8 = vadd.f32 %v1280_v7, %v1272_v60 }
 0x262   : > { %v1279_v63 = vpop.xlane.xlu1 %1278 }
 0x263   : > { %v1284_v2 = vadd.f32 %v1283_v61, %v1279_v63 }
 0x265   : > { %v1287_v3 = vadd.f32 %v1286_v62, %v1284_v2 }
 0x267   : > { %1307 = vrot.lane.b32.xlu0 %v1287_v3, %s1927_s14 }
 0x26b   : > { %1474 = vrot.lane.b32.xlu0 %v252_v16, %s1927_s14 }
 0x2d9   : > { %v1308_v9 = vpop.permute.xlu0 %1307 }
 0x2da   : > { %v1311_v11 = vsel %vm1310_vm14, %v1281_v8, %v1308_v9 }
 0x2db   : > { %1714 = vmatpush3.msra.mxu0 %v1311_v11 }
 0x2dc   : > { %1716 = vmatmul.mubr.msk.f32.vlgmr.msra.gmra.mrb[4].mxu0 %vm284_vm3, %v1628_v10  ;;  %vm1395_vm3 = vcmask 15360  }
 0x2dd   : > { %v1475_v26 = vpop.permute.xlu0 %1474 }
 0x3af   : > { %v1381_v12 = vpop.f32.mrb[4].mxu0 }
 0x3b0   : > { %v1385_v13 = vmul.f32 0.0009765625, %v1381_v12  ;;  %v1717_v14 = vpop.f32.mrb[5].mxu0 }
 0x3b2   : > { %v1386_v15 = vmul.f32 %v1385_v13, %v1385_v13 }
 0x3b4   : > { %1388 = vrot.lane.b32.xlu1 %v1386_v15, %s1927_s14  ;;  %s1930_s14 = smov [#allocation2]  }
 0x3b5   : > { %s1856_s15 = sshll.u32 %s1930_s14, 4  ;;  %s1857_s15 = int_to_ptr.vmem [resolvable:$false] %s1856_s15 }
 0x3b6   : > { %s1858_s16 = scalar_lea.vmem %s1857_s15, 768  ;;  %p1859_p0 = scmp.lt.s32.totalorder %s2205_s9, %s1857_s15 }
 0x3b7   : > { %p1860_p1 = scmp.lt.s32.totalorder %s1858_s16, %s1852_s13 }
 0x3b9   : > { %p1861_p2 = por %p1860_p1, %p1859_p0 }
 0x3bb   : > { %p1862_p3 = pnand %p1861_p2, %p1855_p13 }
 0x426   : > { %v1389_v17 = vpop.permute.xlu1 %1388 }
 0x427   : > { %v1391_v18 = vsub.f32 %v1385_v13, %v1389_v17 }
 0x429   : > { %v1392_v20 = vadd.f32 1e-05, %v1391_v18 }
 0x42b   : > { %1850 = vrsqrt.f32 %v1392_v20 }
 0x435   : > { %v1851_v22 = vpop.eup %1850 }
 0x436   : > { %v1394_v24 = vsel %vm1310_vm14, %v1385_v13, %v1851_v22 }
 0x437   : > { %1719 = vmatpush3.msk.msra.mxu1 %vm1399_vm2, %v1394_v24 }
 0x438   : > { %1721 = vmatmul.mubr.msk.f32.vlgmr.msra.gmra.mrb[4].mxu1 %vm1395_vm3, %v1629_v23 }
 0x50b   : > { %v1469_v27 = vpop.f32.mrb[4].mxu1 }
 0x50c   : > { %v1477_v28 = vmul.f32 %v1475_v26, %v1469_v27  ;;  %v1722_v29 = vpop.f32.mrb[5].mxu1  ;;  %v1478_v30 = vsub.f32 %v251_v57, %v1469_v27 }
 0x50e   : > { %1486 = vperm.xlu0 %1842, %v1477_v28   ;;  %1480 = vrot.lane.b32.xlu1 %v1477_v28, %s1929_s17 }
 0x512   : > { %1844 = vset.pattern.permute.xlu0 %v1917_v1 }
 0x580   : > { %v1481_v31 = vpop.permute.xlu1 %1480 }
 0x581   : > { %v1483_v32 = vmul.f32 %v1481_v31, %v1478_v30 }
 0x583   : > { %v1484_v33 = vadd.f32 %v1483_v32, %v253_v0 }
 0x585   : > { %1494 = vperm.xlu1 %1843, %v1484_v33  }
 0x58d   : > { %v1487_v34 = vpop.permute.xlu0 %1486 }
 0x58e   : > { %v1489_v35 = vmul.f32 %v1487_v34, %v2165_v39  ;;  %v1490_v36 = vmul.f32 %v1487_v34, %v2170_v42  ;;  %v1491_v37 = vmul.f32 %v1487_v34, %v2167_v40 }
 0x604   : > { %v1495_v1 = vpop.permute.xlu1 %1494 }
 0x605   : > { %v1497_v38 = vadd.f32 %v1495_v1, %v1489_v35  ;;  %v1498_v41 = vadd.f32 %v1495_v1, %v1490_v36  ;;  %v1499_v43 = vadd.f32 %v1495_v1, %v1491_v37 }
 0x607   : > { %v1500_v44 = vmax.f32 %v1497_v38, 0.0  ;;  %v1501_v45 = vmax.f32 %v1498_v41, 0.0  ;;  %v1502_v46 = vmax.f32 %v1499_v43, 0.0 }
 0x609   : > { %1503 = vst [vmem:[%s244_s29] sm:$0xff] %v1500_v44  ;;  %1504 = vst [vmem:[%s244_s29 + $0x8] sm:$0xff] %v1501_v45 }
 0x60a   : > { %1505 = vst [vmem:[%s244_s29 + $0x10] sm:$0xff] %v1502_v46 }
 0x60b   : > { %1865 = shalt.err (!%p1862_p3)
}
 0x60c   : > { %s1866_s17 = scalar_lea.hbm %s2203_s12, 384  ;;  %s1870_s20 = scalar_lea.hbm %s2251_s6, 768 }
 0x60d   : > { %p1867_p4 = scmp.ne.s32.totalorder %s2203_s12, %s1866_s17  ;;  %p1871_p9 = scmp.lt.u32.totalorder %s2203_s12, %s2251_s6 }
 0x60e   : > { %p1872_p10 = scmp.lt.u32.totalorder %s1870_s20, %s1866_s17  ;;  %p1874_p12 = scmp.lt.u32.totalorder %s1866_s17, %s2203_s12 }
 0x60f   : > { %p1868_p7 = pnand %p1867_p4, %p2004_p5 }
 0x610   : > { %p1873_p11 = por %p1872_p10, %p1871_p9 }
 0x611   : > { %p1869_p8 = pneg %p1868_p7 }
 0x612   : > { %p1875_p13 = por %p1874_p12, %p1873_p11 }
 0x614   : > { %p1876_p0 = pnand %p1875_p13, %p1869_p8 }
 0x616   : > { %1879 = shalt.err (!%p1876_p0)
}
 0x617   : > { %1789 = dma.vmem_to_hbm [thread:$0]  (%p2004_p5), %s2205_s9, 384, %s2203_s12, %s1507_s25  }
 0x618 PF: > { %p1795_p1 = scmp.ge.s32.totalorder %s1914_s24, 2  ;;  %s1533_s29 = sand.u32 1, %s1902_s21  }
 0x619   : > { %s1534_s10 = scalar_lea.sflag [#allocation3], %s1533_s29 }
 0x61a   : > { %p1792_p2 = pnand %p1795_p1, %p2008_p6 }
 0x61c   : > { %1897 = dma.done.wait (!%p1792_p2), %s1534_s10, 384  }
 0x61d   : > { %1899 = vsyncadd (!%p1792_p2), %s1534_s10, 4294966912  ;;  %p16_p3 = scmp.ge.s32.totalorder %s1991_s27, 4   ;;  %s2254_s21 = smov %s1906_s22 }
 0x61e   : > { %s2255_s22 = smov %s1910_s23  ;;  %s2256_s23 = smov %s2002_s30 }
 0x61f   : > { %s2257_s24 = smov %s1991_s27  ;;  %18 = sbr.rel (!%p16_p3) target bundleno = 3 (0x3), region = 87 }
 0x626   :  { %1539 = vsyncpa [#allocation3], 1 }
 0x627   :  { %1541 = vsyncpa [#allocation3 + $0x1], 1 }

</bundles_post_ra>
